<compile_context>
chip_gen: v7x
topology: tpu7x:2x2x1
jax: 0.10.0
libtpu: 0.0.40
codegen_flags: <defaults>
</compile_context>

<pallas_src>
import math

import jax
import jax.numpy as jnp
from jax.experimental import pallas as pl
from jax.experimental.pallas import tpu as pltpu

# ---- small synthetic BERT config (the torch module loads bert-base-uncased; we
# ---- build a tiny deterministic model with the same forward semantics). ----
VOCAB = 30
TYPE_VOCAB = 2
MAX_POS = 16
HIDDEN = 32
N_HEADS = 2
HEAD_DIM = HIDDEN // N_HEADS
INTER = 64
N_LAYERS = 2
LN_EPS = 1e-12

VECW = max(HIDDEN, INTER)        # lane width of the packed bias/LayerNorm slab
DOT_DT = jnp.bfloat16            # MXU operand dtype (accumulation stays f32)


def _layernorm(x, g, b):
    mu = jnp.mean(x, axis=-1, keepdims=True)
    var = jnp.mean((x - mu) ** 2, axis=-1, keepdims=True)
    return (x - mu) * jax.lax.rsqrt(var + LN_EPS) * g + b


def _gelu(x):
    # TODO(synk): BERT uses exact erf GELU; tanh approximation used here (EUP-friendly).
    c = math.sqrt(2.0 / math.pi)
    return 0.5 * x * (1.0 + jnp.tanh(c * (x + 0.044715 * x * x * x)))


# ---------------------------- fused encoder kernel ----------------------------

def bert_encoder_kernel(emb_ref, bias_ref, embln_ref,
                        wqkv_ref, bqkv_ref, wo_ref, wff1_ref, wff2_ref, vec_ref,
                        o_ref, act_ref):
    layer = pl.program_id(1)

    # Layer 0: fold the embedding LayerNorm in and seed the resident activation.
    @pl.when(layer == 0)
    def _():
        e = emb_ref[0]                                               # (S, H) f32
        act_ref[...] = _layernorm(e, embln_ref[0:1, :], embln_ref[1:2, :])

    x = act_ref[...]                                                 # (S, H) f32

    vec = vec_ref[0]                                                 # (8, VECW) f32
    b_o  = vec[0:1, :HIDDEN]
    b_f1 = vec[1:2, :INTER]
    b_f2 = vec[2:3, :HIDDEN]
    ln1g = vec[3:4, :HIDDEN]
    ln1b = vec[4:5, :HIDDEN]
    ln2g = vec[5:6, :HIDDEN]
    ln2b = vec[6:7, :HIDDEN]

    # --- self-attention, head-batched (leading axis = [q heads | k heads | v heads])
    xb = jnp.broadcast_to(x.astype(DOT_DT), (3 * N_HEADS,) + x.shape)
    qkv = jnp.einsum('nsh,nhd->nsd', xb, wqkv_ref[0],
                     preferred_element_type=jnp.float32) + bqkv_ref[0]   # (3N, S, D)
    q3 = qkv[:N_HEADS]                 # (N, S, D); 1/sqrt(D) already folded into W_q
    k3 = qkv[N_HEADS:2 * N_HEADS]
    v3 = qkv[2 * N_HEADS:]

    s = jnp.einsum('nsd,ntd->nst', q3.astype(DOT_DT), k3.astype(DOT_DT),
                   preferred_element_type=jnp.float32)                   # (N, S, S)
    s = s + bias_ref[...]                                                # (1,1,S) additive mask
    m = jnp.max(s, axis=-1, keepdims=True)
    p = jnp.exp(s - m)
    p = p * pl.reciprocal(jnp.sum(p, axis=-1, keepdims=True), approx=True)
    ctx = jnp.einsum('nst,ntd->nsd', p.astype(DOT_DT), v3.astype(DOT_DT),
                     preferred_element_type=jnp.float32)                 # (N, S, D)
    attn = jnp.einsum('nsd,ndh->nsh', ctx.astype(DOT_DT), wo_ref[0],
                      preferred_element_type=jnp.float32)                # (N, S, H)
    attn = jnp.sum(attn, axis=0) + b_o                                   # (S, H)

    h1 = _layernorm(x + attn, ln1g, ln1b)

    # --- FFN
    ff = _gelu(jnp.dot(h1.astype(DOT_DT), wff1_ref[0],
                       preferred_element_type=jnp.float32) + b_f1)       # (S, INTER)
    ff = jnp.dot(ff.astype(DOT_DT), wff2_ref[0],
                 preferred_element_type=jnp.float32) + b_f2              # (S, H)
    y = _layernorm(h1 + ff, ln2g, ln2b)
    act_ref[...] = y

    # Only HBM store: final hidden state after the last layer.
    @pl.when(layer == pl.num_programs(1) - 1)
    def _():
        o_ref[0] = y


# ---------------------------- wrapper ----------------------------

def bert_encoder(emb, attn_bias, packed):
    B, S, H = emb.shape
    L = packed['w_qkv_h'].shape[0]
    return pl.pallas_call(
        bert_encoder_kernel,
        out_shape=jax.ShapeDtypeStruct((B, S, H), jnp.float32),
        grid=(B, L),
        in_specs=[
            pl.BlockSpec((1, S, H), lambda b, l: (b, 0, 0)),                        # embeddings
            pl.BlockSpec((1, 1, S), lambda b, l: (b, 0, 0)),                        # attn bias
            pl.BlockSpec((2, H), lambda b, l: (0, 0)),                              # emb LN g/b
            pl.BlockSpec((1, 3 * N_HEADS, H, HEAD_DIM), lambda b, l: (l, 0, 0, 0)),  # QKV W (per head)
            pl.BlockSpec((1, 3 * N_HEADS, 1, HEAD_DIM), lambda b, l: (l, 0, 0, 0)),  # QKV bias
            pl.BlockSpec((1, N_HEADS, HEAD_DIM, H), lambda b, l: (l, 0, 0, 0)),      # out-proj W
            pl.BlockSpec((1, H, INTER), lambda b, l: (l, 0, 0)),                     # FFN up
            pl.BlockSpec((1, INTER, H), lambda b, l: (l, 0, 0)),                     # FFN down
            pl.BlockSpec((1, 8, VECW), lambda b, l: (l, 0, 0)),                      # biases + LN slab
        ],
        out_specs=pl.BlockSpec((1, S, H), lambda b, l: (b, 0, 0)),
        scratch_shapes=[pltpu.VMEM((S, H), jnp.float32)],
        compiler_params=pltpu.CompilerParams(
            dimension_semantics=("parallel", "arbitrary")),
    )(emb, attn_bias, packed['emb_ln'], packed['w_qkv_h'], packed['b_qkv_h'],
      packed['wo_h'], packed['w_ff1'], packed['w_ff2'], packed['vecs'])


def bert_text_encoder_forward(text, packed):
    """text: (B, 3, S) — [input_ids, input_mask, segment_ids] along dim 1."""
    # ids/segments ride through float32 inside `text` (exact for vocab < 2^24).
    input_ids = text[:, 0, :].astype(jnp.int32)      # .long()
    input_mask = text[:, 1, :].astype(jnp.float32)   # .float()
    segment_ids = text[:, 2, :].astype(jnp.int32)    # .long()
    B, S = input_ids.shape

    # Embedding gathers stay in plain JAX (glue); LN + all layers run in the kernel.
    emb = (packed['word_emb'][input_ids]
           + packed['pos_emb'][:S][None, :, :]
           + packed['type_emb'][segment_ids]).astype(jnp.float32)
    attn_bias = ((1.0 - input_mask) * (-10000.0))[:, None, :]          # (B, 1, S)
    return bert_encoder(emb, attn_bias, packed)                        # (B, S, H)


# ---------------------------- parameter setup (glue) ----------------------------

def init_params(key):
    std = 0.02
    ks = jax.random.split(key, 3 + N_LAYERS)
    params = {
        'word_emb': (std * jax.random.normal(ks[0], (VOCAB, HIDDEN))).astype(jnp.float32),
        'pos_emb': (std * jax.random.normal(ks[1], (MAX_POS, HIDDEN))).astype(jnp.float32),
        'type_emb': (std * jax.random.normal(ks[2], (TYPE_VOCAB, HIDDEN))).astype(jnp.float32),
        'emb_ln_g': jnp.ones((1, HIDDEN), jnp.float32),
        'emb_ln_b': jnp.zeros((1, HIDDEN), jnp.float32),
        'layers': [],
    }
    for l in range(N_LAYERS):
        lk = jax.random.split(ks[3 + l], 6)
        lp = {
            'wq': (std * jax.random.normal(lk[0], (HIDDEN, HIDDEN))).astype(jnp.float32),
            'bq': jnp.zeros((1, HIDDEN), jnp.float32),
            'wk': (std * jax.random.normal(lk[1], (HIDDEN, HIDDEN))).astype(jnp.float32),
            'bk': jnp.zeros((1, HIDDEN), jnp.float32),
            'wv': (std * jax.random.normal(lk[2], (HIDDEN, HIDDEN))).astype(jnp.float32),
            'bv': jnp.zeros((1, HIDDEN), jnp.float32),
            'wo': (std * jax.random.normal(lk[3], (HIDDEN, HIDDEN))).astype(jnp.float32),
            'bo': jnp.zeros((1, HIDDEN), jnp.float32),
            'ln1_g': jnp.ones((1, HIDDEN), jnp.float32),
            'ln1_b': jnp.zeros((1, HIDDEN), jnp.float32),
            'w1': (std * jax.random.normal(lk[4], (HIDDEN, INTER))).astype(jnp.float32),
            'b1': jnp.zeros((1, INTER), jnp.float32),
            'w2': (std * jax.random.normal(lk[5], (INTER, HIDDEN))).astype(jnp.float32),
            'b2': jnp.zeros((1, HIDDEN), jnp.float32),
            'ln2_g': jnp.ones((1, HIDDEN), jnp.float32),
            'ln2_b': jnp.zeros((1, HIDDEN), jnp.float32),
        }
        params['layers'].append(lp)
    return params


def pack_params(raw):
    """Free wrapper-side repack: 16 tiny per-layer tensors -> 6 layer-stacked slabs."""
    scale = 1.0 / math.sqrt(HEAD_DIM)

    def col_heads(w):        # (H, H) -> (N_HEADS, H, HEAD_DIM): split output columns per head
        return w.reshape(HIDDEN, N_HEADS, HEAD_DIM).transpose(1, 0, 2)

    def col_heads_b(b):      # (1, H) -> (N_HEADS, 1, HEAD_DIM)
        return b.reshape(N_HEADS, HEAD_DIM)[:, None, :]

    def pad_row(v):          # (1, w) -> (VECW,)
        v = v.reshape(-1)
        return jnp.pad(v, (0, VECW - v.shape[0]))

    w_qkv, b_qkv, w_o, w_f1, w_f2, vecs = [], [], [], [], [], []
    for lp in raw['layers']:
        w_qkv.append(jnp.concatenate([col_heads(lp['wq']) * scale,    # fold 1/sqrt(D) into Q
                                      col_heads(lp['wk']),
                                      col_heads(lp['wv'])], axis=0))            # (3N, H, D)
        b_qkv.append(jnp.concatenate([col_heads_b(lp['bq']) * scale,
                                      col_heads_b(lp['bk']),
                                      col_heads_b(lp['bv'])], axis=0))          # (3N, 1, D)
        w_o.append(lp['wo'].reshape(N_HEADS, HEAD_DIM, HIDDEN))                 # (N, D, H)
        w_f1.append(lp['w1'])
        w_f2.append(lp['w2'])
        vecs.append(jnp.stack([pad_row(lp['bo']), pad_row(lp['b1']), pad_row(lp['b2']),
                               pad_row(lp['ln1_g']), pad_row(lp['ln1_b']),
                               pad_row(lp['ln2_g']), pad_row(lp['ln2_b']),
                               jnp.zeros((VECW,), jnp.float32)], axis=0))       # (8, VECW)

    return {
        'word_emb': raw['word_emb'], 'pos_emb': raw['pos_emb'], 'type_emb': raw['type_emb'],
        'emb_ln': jnp.concatenate([raw['emb_ln_g'], raw['emb_ln_b']], axis=0),  # (2, H)
        'w_qkv_h': jnp.stack(w_qkv).astype(DOT_DT),
        'b_qkv_h': jnp.stack(b_qkv).astype(jnp.float32),
        'wo_h': jnp.stack(w_o).astype(DOT_DT),
        'w_ff1': jnp.stack(w_f1).astype(DOT_DT),
        'w_ff2': jnp.stack(w_f2).astype(DOT_DT),
        'vecs': jnp.stack(vecs).astype(jnp.float32),
    }


# ---------------------------- pure-JAX reference ----------------------------

def reference_forward(text, raw):
    input_ids = text[:, 0, :].astype(jnp.int32)
    input_mask = text[:, 1, :].astype(jnp.float32)
    segment_ids = text[:, 2, :].astype(jnp.int32)
    B, S = input_ids.shape
    x = (raw['word_emb'][input_ids] + raw['pos_emb'][:S][None, :, :]
         + raw['type_emb'][segment_ids])
    x = _layernorm(x, raw['emb_ln_g'], raw['emb_ln_b'])
    bias = ((1.0 - input_mask) * (-10000.0))[:, None, None, :]       # (B,1,1,S)
    scale = 1.0 / math.sqrt(HEAD_DIM)
    for lp in raw['layers']:
        q = (x @ lp['wq'] + lp['bq']).reshape(B, S, N_HEADS, HEAD_DIM)
        k = (x @ lp['wk'] + lp['bk']).reshape(B, S, N_HEADS, HEAD_DIM)
        v = (x @ lp['wv'] + lp['bv']).reshape(B, S, N_HEADS, HEAD_DIM)
        s = jnp.einsum('bsnd,btnd->bnst', q, k) * scale + bias
        p = jax.nn.softmax(s, axis=-1)
        ctx = jnp.einsum('bnst,btnd->bsnd', p, v).reshape(B, S, HIDDEN)
        x = _layernorm(x + ctx @ lp['wo'] + lp['bo'], lp['ln1_g'], lp['ln1_b'])
        ff = _gelu(x @ lp['w1'] + lp['b1']) @ lp['w2'] + lp['b2']
        x = _layernorm(x + ff, lp['ln2_g'], lp['ln2_b'])
    return x


if __name__ == "__main__":
    key = jax.random.PRNGKey(0)
    pkey, ikey = jax.random.split(key)
    raw = init_params(pkey)
    packed = pack_params(raw)

    B, S = 2, 8
    ids = jax.random.randint(ikey, (B, S), 0, VOCAB).astype(jnp.float32)
    mask = jnp.ones((B, S), jnp.float32).at[1, 6:].set(0.0)       # pad tail of row 1
    types = jnp.concatenate([jnp.zeros((B, S // 2)), jnp.ones((B, S // 2))],
                            axis=-1).astype(jnp.float32)
    text = jnp.stack([ids, mask, types], axis=1)                  # (B, 3, S)

    out = jax.block_until_ready(bert_text_encoder_forward(text, packed))
    assert out.shape == (B, S, HIDDEN) and out.dtype == jnp.float32

    ref = jax.block_until_ready(reference_forward(text, raw))
    assert float(jnp.max(jnp.abs(out - ref))) < 0.15   # bf16 MXU operands vs f32 reference

    print("KERNEL_OK")
</pallas_src>

<mosaic_0001>
module attributes {stable_mosaic.version = 11 : i64} {
  func.func @bert_encoder_kernel(%arg0: i32, %arg1: i32, %arg2: memref<1x8x32xf32, #tpu.memory_space<vmem>>, %arg3: memref<1x1x8xf32, #tpu.memory_space<vmem>>, %arg4: memref<2x32xf32, #tpu.memory_space<vmem>>, %arg5: memref<1x6x32x16xbf16, #tpu.memory_space<vmem>>, %arg6: memref<1x6x1x16xf32, #tpu.memory_space<vmem>>, %arg7: memref<1x2x16x32xbf16, #tpu.memory_space<vmem>>, %arg8: memref<1x32x64xbf16, #tpu.memory_space<vmem>>, %arg9: memref<1x64x32xbf16, #tpu.memory_space<vmem>>, %arg10: memref<1x8x64xf32, #tpu.memory_space<vmem>>, %arg11: memref<1x8x32xf32, #tpu.memory_space<vmem>>, %arg12: memref<8x32xf32, #tpu.memory_space<vmem>>) attributes {dimension_semantics = [#tpu.dimension_semantics<parallel>, #tpu.dimension_semantics<arbitrary>], iteration_bounds = array<i64: 2, 2>, scalar_prefetch = 0 : i64, scratch_operands = 1 : i64, tpu.core_type = #tpu.core_type<tc>, window_params = [{transform_indices = @transform_0, window_bounds = array<i64: 1, 8, 32>}, {transform_indices = @transform_1, window_bounds = array<i64: 1, 1, 8>}, {pipeline_mode = #tpu.pipeline_mode<synchronous>, transform_indices = @transform_2, window_bounds = array<i64: 2, 32>}, {transform_indices = @transform_3, window_bounds = array<i64: 1, 6, 32, 16>}, {transform_indices = @transform_4, window_bounds = array<i64: 1, 6, 1, 16>}, {transform_indices = @transform_5, window_bounds = array<i64: 1, 2, 16, 32>}, {transform_indices = @transform_6, window_bounds = array<i64: 1, 32, 64>}, {transform_indices = @transform_7, window_bounds = array<i64: 1, 64, 32>}, {transform_indices = @transform_8, window_bounds = array<i64: 1, 8, 64>}, {transform_indices = @transform_9, window_bounds = array<i64: 1, 8, 32>}]} {
    %c0_i32 = arith.constant 0 : i32
    %0 = arith.cmpi eq, %arg1, %c0_i32 : i32
    %1 = arith.extui %0 : i1 to i32
    %c0_i32_0 = arith.constant 0 : i32
    %2 = arith.cmpi ne, %1, %c0_i32_0 : i32
    scf.if %2 {
      %c0_51 = arith.constant 0 : index
      %c0_52 = arith.constant 0 : index
      %c0_53 = arith.constant 0 : index
      %127 = vector.load %arg2[%c0_51, %c0_52, %c0_53] : memref<1x8x32xf32, #tpu.memory_space<vmem>>, vector<1x8x32xf32>
      %128 = vector.shape_cast %127 : vector<1x8x32xf32> to vector<8x32xf32>
      %c0_54 = arith.constant 0 : index
      %c0_55 = arith.constant 0 : index
      %129 = vector.load %arg4[%c0_54, %c0_55] : memref<2x32xf32, #tpu.memory_space<vmem>>, vector<1x32xf32>
      %c1 = arith.constant 1 : index
      %c0_56 = arith.constant 0 : index
      %130 = vector.load %arg4[%c1, %c0_56] : memref<2x32xf32, #tpu.memory_space<vmem>>, vector<1x32xf32>
      %cst_57 = arith.constant dense<0.000000e+00> : vector<8xf32>
      %131 = vector.multi_reduction <add>, %128, %cst_57 [1] : vector<8x32xf32> to vector<8xf32>
      %132 = vector.shape_cast %131 : vector<8xf32> to vector<8x1xf32>
      %cst_58 = arith.constant 3.200000e+01 : f32
      %133 = vector.broadcast %cst_58 : f32 to vector<8x1xf32>
      %134 = arith.divf %132, %133 : vector<8x1xf32>
      %135 = vector.broadcast %134 : vector<8x1xf32> to vector<8x32xf32>
      %136 = arith.subf %128, %135 : vector<8x32xf32>
      %137 = arith.mulf %136, %136 : vector<8x32xf32>
      %cst_59 = arith.constant dense<0.000000e+00> : vector<8xf32>
      %138 = vector.multi_reduction <add>, %137, %cst_59 [1] : vector<8x32xf32> to vector<8xf32>
      %139 = vector.shape_cast %138 : vector<8xf32> to vector<8x1xf32>
      %cst_60 = arith.constant 3.200000e+01 : f32
      %140 = vector.broadcast %cst_60 : f32 to vector<8x1xf32>
      %141 = arith.divf %139, %140 : vector<8x1xf32>
      %142 = vector.broadcast %134 : vector<8x1xf32> to vector<8x32xf32>
      %143 = arith.subf %128, %142 : vector<8x32xf32>
      %cst_61 = arith.constant 9.99999996E-13 : f32
      %144 = vector.broadcast %cst_61 : f32 to vector<8x1xf32>
      %145 = arith.addf %141, %144 : vector<8x1xf32>
      %146 = math.rsqrt %145 : vector<8x1xf32>
      %147 = vector.broadcast %146 : vector<8x1xf32> to vector<8x32xf32>
      %148 = arith.mulf %143, %147 : vector<8x32xf32>
      %149 = vector.broadcast %129 : vector<1x32xf32> to vector<8x32xf32>
      %150 = arith.mulf %148, %149 : vector<8x32xf32>
      %151 = vector.broadcast %130 : vector<1x32xf32> to vector<8x32xf32>
      %152 = arith.addf %150, %151 : vector<8x32xf32>
      %c0_62 = arith.constant 0 : index
      %c0_63 = arith.constant 0 : index
      %153 = vector.load %arg12[%c0_62, %c0_63] : memref<8x32xf32, #tpu.memory_space<vmem>>, vector<8x32xf32>
      tpu.vector_store %arg12[%c0_62, %c0_63], %152 {strides = array<i32>} : memref<8x32xf32, #tpu.memory_space<vmem>>, vector<8x32xf32>,
    } else {
    }
    %c0 = arith.constant 0 : index
    %c0_1 = arith.constant 0 : index
    %3 = vector.load %arg12[%c0, %c0_1] : memref<8x32xf32, #tpu.memory_space<vmem>>, vector<8x32xf32>
    %c0_2 = arith.constant 0 : index
    %c0_3 = arith.constant 0 : index
    %c0_4 = arith.constant 0 : index
    %4 = vector.load %arg10[%c0_2, %c0_3, %c0_4] : memref<1x8x64xf32, #tpu.memory_space<vmem>>, vector<1x8x64xf32>
    %5 = vector.shape_cast %4 : vector<1x8x64xf32> to vector<8x64xf32>
    %6 = vector.extract_strided_slice %5 {offsets = [0, 0], sizes = [1, 32], strides = [1, 1]} : vector<8x64xf32> to vector<1x32xf32>
    %7 = vector.extract_strided_slice %5 {offsets = [1, 0], sizes = [1, 64], strides = [1, 1]} : vector<8x64xf32> to vector<1x64xf32>
    %8 = vector.extract_strided_slice %5 {offsets = [2, 0], sizes = [1, 32], strides = [1, 1]} : vector<8x64xf32> to vector<1x32xf32>
    %9 = vector.extract_strided_slice %5 {offsets = [3, 0], sizes = [1, 32], strides = [1, 1]} : vector<8x64xf32> to vector<1x32xf32>
    %10 = vector.extract_strided_slice %5 {offsets = [4, 0], sizes = [1, 32], strides = [1, 1]} : vector<8x64xf32> to vector<1x32xf32>
    %11 = vector.extract_strided_slice %5 {offsets = [5, 0], sizes = [1, 32], strides = [1, 1]} : vector<8x64xf32> to vector<1x32xf32>
    %12 = vector.extract_strided_slice %5 {offsets = [6, 0], sizes = [1, 32], strides = [1, 1]} : vector<8x64xf32> to vector<1x32xf32>
    %13 = arith.truncf %3 : vector<8x32xf32> to vector<8x32xbf16>
    %14 = vector.shape_cast %13 : vector<8x32xbf16> to vector<1x8x32xbf16>
    %15 = vector.broadcast %14 : vector<1x8x32xbf16> to vector<6x8x32xbf16>
    %c0_5 = arith.constant 0 : index
    %c0_6 = arith.constant 0 : index
    %c0_7 = arith.constant 0 : index
    %c0_8 = arith.constant 0 : index
    %16 = vector.load %arg5[%c0_5, %c0_6, %c0_7, %c0_8] : memref<1x6x32x16xbf16, #tpu.memory_space<vmem>>, vector<1x6x32x16xbf16>
    %17 = vector.shape_cast %16 : vector<1x6x32x16xbf16> to vector<6x32x16xbf16>
    "tpu.trace_start"() <{level = 10 : i32, message = "nsh,nhd->nsd"}> : () -> ()
    %cst = arith.constant dense<0.000000e+00> : vector<6x8x16xf32>
    %18 = tpu.matmul %15, %17, %cst {dimension_numbers = #tpu.dot_dimension_numbers<[2], [1], [1], [2], [0, 0, 0, 1, 1, 2], [0], [0]>} : vector<6x8x32xbf16>, vector<6x32x16xbf16>, vector<6x8x16xf32> -> vector<6x8x16xf32>
    "tpu.trace_stop"() : () -> ()
    %c0_9 = arith.constant 0 : index
    %c0_10 = arith.constant 0 : index
    %c0_11 = arith.constant 0 : index
    %c0_12 = arith.constant 0 : index
    %19 = vector.load %arg6[%c0_9, %c0_10, %c0_11, %c0_12] : memref<1x6x1x16xf32, #tpu.memory_space<vmem>>, vector<1x6x1x16xf32>
    %20 = vector.shape_cast %19 : vector<1x6x1x16xf32> to vector<6x1x16xf32>
    %21 = vector.broadcast %20 : vector<6x1x16xf32> to vector<6x8x16xf32>
    %22 = arith.addf %18, %21 : vector<6x8x16xf32>
    %23 = vector.extract_strided_slice %22 {offsets = [0, 0, 0], sizes = [2, 8, 16], strides = [1, 1, 1]} : vector<6x8x16xf32> to vector<2x8x16xf32>
    %24 = vector.extract_strided_slice %22 {offsets = [2, 0, 0], sizes = [2, 8, 16], strides = [1, 1, 1]} : vector<6x8x16xf32> to vector<2x8x16xf32>
    %25 = vector.extract_strided_slice %22 {offsets = [4, 0, 0], sizes = [2, 8, 16], strides = [1, 1, 1]} : vector<6x8x16xf32> to vector<2x8x16xf32>
    %26 = arith.truncf %23 : vector<2x8x16xf32> to vector<2x8x16xbf16>
    %27 = arith.truncf %24 : vector<2x8x16xf32> to vector<2x8x16xbf16>
    "tpu.trace_start"() <{level = 10 : i32, message = "nsd,ntd->nst"}> : () -> ()
    %cst_13 = arith.constant dense<0.000000e+00> : vector<2x8x8xf32>
    %28 = tpu.matmul %26, %27, %cst_13 {dimension_numbers = #tpu.dot_dimension_numbers<[2], [2], [1], [1], [0, 0, 0, 1, 1, 1], [0], [0]>} : vector<2x8x16xbf16>, vector<2x8x16xbf16>, vector<2x8x8xf32> -> vector<2x8x8xf32>
    "tpu.trace_stop"() : () -> ()
    %c0_14 = arith.constant 0 : index
    %c0_15 = arith.constant 0 : index
    %c0_16 = arith.constant 0 : index
    %29 = vector.load %arg3[%c0_14, %c0_15, %c0_16] : memref<1x1x8xf32, #tpu.memory_space<vmem>>, vector<1x1x8xf32>
    %30 = vector.broadcast %29 : vector<1x1x8xf32> to vector<2x8x8xf32>
    %31 = arith.addf %28, %30 : vector<2x8x8xf32>
    %cst_17 = arith.constant dense<0xFF800000> : vector<2x8xf32>
    %32 = vector.multi_reduction <maximumf>, %31, %cst_17 [2] : vector<2x8x8xf32> to vector<2x8xf32>
    %33 = vector.shape_cast %32 : vector<2x8xf32> to vector<2x8x1xf32>
    %34 = vector.broadcast %33 : vector<2x8x1xf32> to vector<2x8x8xf32>
    %35 = arith.subf %31, %34 : vector<2x8x8xf32>
    %36 = math.exp %35 : vector<2x8x8xf32>
    %cst_18 = arith.constant dense<0.000000e+00> : vector<2x8xf32>
    %37 = vector.multi_reduction <add>, %36, %cst_18 [2] : vector<2x8x8xf32> to vector<2x8xf32>
    %38 = vector.shape_cast %37 : vector<2x8xf32> to vector<2x8x1xf32>
    %39 = tpu.reciprocal %38 {approx = true} : vector<2x8x1xf32> -> vector<2x8x1xf32>
    %40 = vector.broadcast %39 : vector<2x8x1xf32> to vector<2x8x8xf32>
    %41 = arith.mulf %36, %40 : vector<2x8x8xf32>
    %42 = arith.truncf %41 : vector<2x8x8xf32> to vector<2x8x8xbf16>
    %43 = arith.truncf %25 : vector<2x8x16xf32> to vector<2x8x16xbf16>
    "tpu.trace_start"() <{level = 10 : i32, message = "nst,ntd->nsd"}> : () -> ()
    %cst_19 = arith.constant dense<0.000000e+00> : vector<2x8x16xf32>
    %44 = tpu.matmul %42, %43, %cst_19 {dimension_numbers = #tpu.dot_dimension_numbers<[2], [1], [1], [2], [0, 0, 0, 1, 1, 2], [0], [0]>} : vector<2x8x8xbf16>, vector<2x8x16xbf16>, vector<2x8x16xf32> -> vector<2x8x16xf32>
    "tpu.trace_stop"() : () -> ()
    %45 = arith.truncf %44 : vector<2x8x16xf32> to vector<2x8x16xbf16>
    %c0_20 = arith.constant 0 : index
    %c0_21 = arith.constant 0 : index
    %c0_22 = arith.constant 0 : index
    %c0_23 = arith.constant 0 : index
    %46 = vector.load %arg7[%c0_20, %c0_21, %c0_22, %c0_23] : memref<1x2x16x32xbf16, #tpu.memory_space<vmem>>, vector<1x2x16x32xbf16>
    %47 = vector.shape_cast %46 : vector<1x2x16x32xbf16> to vector<2x16x32xbf16>
    "tpu.trace_start"() <{level = 10 : i32, message = "nsd,ndh->nsh"}> : () -> ()
    %cst_24 = arith.constant dense<0.000000e+00> : vector<2x8x32xf32>
    %48 = tpu.matmul %45, %47, %cst_24 {dimension_numbers = #tpu.dot_dimension_numbers<[2], [1], [1], [2], [0, 0, 0, 1, 1, 2], [0], [0]>} : vector<2x8x16xbf16>, vector<2x16x32xbf16>, vector<2x8x32xf32> -> vector<2x8x32xf32>
    "tpu.trace_stop"() : () -> ()
    %cst_25 = arith.constant dense<0.000000e+00> : vector<8x32xf32>
    %49 = vector.multi_reduction <add>, %48, %cst_25 [0] : vector<2x8x32xf32> to vector<8x32xf32>
    %50 = vector.broadcast %6 : vector<1x32xf32> to vector<8x32xf32>
    %51 = arith.addf %49, %50 : vector<8x32xf32>
    %52 = arith.addf %3, %51 : vector<8x32xf32>
    %cst_26 = arith.constant dense<0.000000e+00> : vector<8xf32>
    %53 = vector.multi_reduction <add>, %52, %cst_26 [1] : vector<8x32xf32> to vector<8xf32>
    %54 = vector.shape_cast %53 : vector<8xf32> to vector<8x1xf32>
    %cst_27 = arith.constant 3.200000e+01 : f32
    %55 = vector.broadcast %cst_27 : f32 to vector<8x1xf32>
    %56 = arith.divf %54, %55 : vector<8x1xf32>
    %57 = vector.broadcast %56 : vector<8x1xf32> to vector<8x32xf32>
    %58 = arith.subf %52, %57 : vector<8x32xf32>
    %59 = arith.mulf %58, %58 : vector<8x32xf32>
    %cst_28 = arith.constant dense<0.000000e+00> : vector<8xf32>
    %60 = vector.multi_reduction <add>, %59, %cst_28 [1] : vector<8x32xf32> to vector<8xf32>
    %61 = vector.shape_cast %60 : vector<8xf32> to vector<8x1xf32>
    %cst_29 = arith.constant 3.200000e+01 : f32
    %62 = vector.broadcast %cst_29 : f32 to vector<8x1xf32>
    %63 = arith.divf %61, %62 : vector<8x1xf32>
    %64 = vector.broadcast %56 : vector<8x1xf32> to vector<8x32xf32>
    %65 = arith.subf %52, %64 : vector<8x32xf32>
    %cst_30 = arith.constant 9.99999996E-13 : f32
    %66 = vector.broadcast %cst_30 : f32 to vector<8x1xf32>
    %67 = arith.addf %63, %66 : vector<8x1xf32>
    %68 = math.rsqrt %67 : vector<8x1xf32>
    %69 = vector.broadcast %68 : vector<8x1xf32> to vector<8x32xf32>
    %70 = arith.mulf %65, %69 : vector<8x32xf32>
    %71 = vector.broadcast %9 : vector<1x32xf32> to vector<8x32xf32>
    %72 = arith.mulf %70, %71 : vector<8x32xf32>
    %73 = vector.broadcast %10 : vector<1x32xf32> to vector<8x32xf32>
    %74 = arith.addf %72, %73 : vector<8x32xf32>
    %75 = arith.truncf %74 : vector<8x32xf32> to vector<8x32xbf16>
    %c0_31 = arith.constant 0 : index
    %c0_32 = arith.constant 0 : index
    %c0_33 = arith.constant 0 : index
    %76 = vector.load %arg8[%c0_31, %c0_32, %c0_33] : memref<1x32x64xbf16, #tpu.memory_space<vmem>>, vector<1x32x64xbf16>
    %77 = vector.shape_cast %76 : vector<1x32x64xbf16> to vector<32x64xbf16>
    %cst_34 = arith.constant dense<0.000000e+00> : vector<8x64xf32>
    %78 = tpu.matmul %75, %77, %cst_34 {dimension_numbers = #tpu.dot_dimension_numbers<[1], [0], [0], [1], [0, 0, 1, 1], [], []>} : vector<8x32xbf16>, vector<32x64xbf16>, vector<8x64xf32> -> vector<8x64xf32>
    %79 = vector.broadcast %7 : vector<1x64xf32> to vector<8x64xf32>
    %80 = arith.addf %78, %79 : vector<8x64xf32>
    %cst_35 = arith.constant 5.000000e-01 : f32
    %81 = vector.broadcast %cst_35 : f32 to vector<8x64xf32>
    %82 = arith.mulf %81, %80 : vector<8x64xf32>
    %cst_36 = arith.constant 4.471500e-02 : f32
    %83 = vector.broadcast %cst_36 : f32 to vector<8x64xf32>
    %84 = arith.mulf %83, %80 : vector<8x64xf32>
    %85 = arith.mulf %84, %80 : vector<8x64xf32>
    %86 = arith.mulf %85, %80 : vector<8x64xf32>
    %87 = arith.addf %80, %86 : vector<8x64xf32>
    %cst_37 = arith.constant 0.797884583 : f32
    %88 = vector.broadcast %cst_37 : f32 to vector<8x64xf32>
    %89 = arith.mulf %88, %87 : vector<8x64xf32>
    %90 = math.tanh %89 : vector<8x64xf32>
    %cst_38 = arith.constant 1.000000e+00 : f32
    %91 = vector.broadcast %cst_38 : f32 to vector<8x64xf32>
    %92 = arith.addf %91, %90 : vector<8x64xf32>
    %93 = arith.mulf %82, %92 : vector<8x64xf32>
    %94 = arith.truncf %93 : vector<8x64xf32> to vector<8x64xbf16>
    %c0_39 = arith.constant 0 : index
    %c0_40 = arith.constant 0 : index
    %c0_41 = arith.constant 0 : index
    %95 = vector.load %arg9[%c0_39, %c0_40, %c0_41] : memref<1x64x32xbf16, #tpu.memory_space<vmem>>, vector<1x64x32xbf16>
    %96 = vector.shape_cast %95 : vector<1x64x32xbf16> to vector<64x32xbf16>
    %cst_42 = arith.constant dense<0.000000e+00> : vector<8x32xf32>
    %97 = tpu.matmul %94, %96, %cst_42 {dimension_numbers = #tpu.dot_dimension_numbers<[1], [0], [0], [1], [0, 0, 1, 1], [], []>} : vector<8x64xbf16>, vector<64x32xbf16>, vector<8x32xf32> -> vector<8x32xf32>
    %98 = vector.broadcast %8 : vector<1x32xf32> to vector<8x32xf32>
    %99 = arith.addf %97, %98 : vector<8x32xf32>
    %100 = arith.addf %74, %99 : vector<8x32xf32>
    %cst_43 = arith.constant dense<0.000000e+00> : vector<8xf32>
    %101 = vector.multi_reduction <add>, %100, %cst_43 [1] : vector<8x32xf32> to vector<8xf32>
    %102 = vector.shape_cast %101 : vector<8xf32> to vector<8x1xf32>
    %cst_44 = arith.constant 3.200000e+01 : f32
    %103 = vector.broadcast %cst_44 : f32 to vector<8x1xf32>
    %104 = arith.divf %102, %103 : vector<8x1xf32>
    %105 = vector.broadcast %104 : vector<8x1xf32> to vector<8x32xf32>
    %106 = arith.subf %100, %105 : vector<8x32xf32>
    %107 = arith.mulf %106, %106 : vector<8x32xf32>
    %cst_45 = arith.constant dense<0.000000e+00> : vector<8xf32>
    %108 = vector.multi_reduction <add>, %107, %cst_45 [1] : vector<8x32xf32> to vector<8xf32>
    %109 = vector.shape_cast %108 : vector<8xf32> to vector<8x1xf32>
    %cst_46 = arith.constant 3.200000e+01 : f32
    %110 = vector.broadcast %cst_46 : f32 to vector<8x1xf32>
    %111 = arith.divf %109, %110 : vector<8x1xf32>
    %112 = vector.broadcast %104 : vector<8x1xf32> to vector<8x32xf32>
    %113 = arith.subf %100, %112 : vector<8x32xf32>
    %cst_47 = arith.constant 9.99999996E-13 : f32
    %114 = vector.broadcast %cst_47 : f32 to vector<8x1xf32>
    %115 = arith.addf %111, %114 : vector<8x1xf32>
    %116 = math.rsqrt %115 : vector<8x1xf32>
    %117 = vector.broadcast %116 : vector<8x1xf32> to vector<8x32xf32>
    %118 = arith.mulf %113, %117 : vector<8x32xf32>
    %119 = vector.broadcast %11 : vector<1x32xf32> to vector<8x32xf32>
    %120 = arith.mulf %118, %119 : vector<8x32xf32>
    %121 = vector.broadcast %12 : vector<1x32xf32> to vector<8x32xf32>
    %122 = arith.addf %120, %121 : vector<8x32xf32>
    %c0_48 = arith.constant 0 : index
    %c0_49 = arith.constant 0 : index
    %123 = vector.load %arg12[%c0_48, %c0_49] : memref<8x32xf32, #tpu.memory_space<vmem>>, vector<8x32xf32>
    tpu.vector_store %arg12[%c0_48, %c0_49], %122 {strides = array<i32>} : memref<8x32xf32, #tpu.memory_space<vmem>>, vector<8x32xf32>,
    %c1_i32 = arith.constant 1 : i32
    %124 = arith.cmpi eq, %arg1, %c1_i32 : i32
    %125 = arith.extui %124 : i1 to i32
    %c0_i32_50 = arith.constant 0 : i32
    %126 = arith.cmpi ne, %125, %c0_i32_50 : i32
    scf.if %126 {
      %c0_51 = arith.constant 0 : index
      %c0_52 = arith.constant 0 : index
      %c0_53 = arith.constant 0 : index
      %127 = vector.load %arg11[%c0_51, %c0_52, %c0_53] : memref<1x8x32xf32, #tpu.memory_space<vmem>>, vector<1x8x32xf32>
      %128 = vector.shape_cast %127 : vector<1x8x32xf32> to vector<8x32xf32>
      %129 = vector.shape_cast %122 : vector<8x32xf32> to vector<1x8x32xf32>
      tpu.vector_store %arg11[%c0_51, %c0_52, %c0_53], %129 {strides = array<i32>} : memref<1x8x32xf32, #tpu.memory_space<vmem>>, vector<1x8x32xf32>,
    } else {
    }
    return
  }
  func.func @transform_0(%arg0: i32, %arg1: i32) -> (i32, i32, i32) {
    %c0_i32 = arith.constant 0 : i32
    %c0_i32_0 = arith.constant 0 : i32
    %c0_i32_1 = arith.constant 0 : i32
    return %arg0, %c0_i32, %c0_i32_0 : i32, i32, i32
  }
  func.func @transform_1(%arg0: i32, %arg1: i32) -> (i32, i32, i32) {
    %c0_i32 = arith.constant 0 : i32
    %c0_i32_0 = arith.constant 0 : i32
    %c0_i32_1 = arith.constant 0 : i32
    return %arg0, %c0_i32, %c0_i32_0 : i32, i32, i32
  }
  func.func @transform_2(%arg0: i32, %arg1: i32) -> (i32, i32) {
    %c0_i32 = arith.constant 0 : i32
    %c0_i32_0 = arith.constant 0 : i32
    %c0_i32_1 = arith.constant 0 : i32
    return %c0_i32, %c0_i32_0 : i32, i32
  }
  func.func @transform_3(%arg0: i32, %arg1: i32) -> (i32, i32, i32, i32) {
    %c0_i32 = arith.constant 0 : i32
    %c0_i32_0 = arith.constant 0 : i32
    %c0_i32_1 = arith.constant 0 : i32
    %c0_i32_2 = arith.constant 0 : i32
    return %arg1, %c0_i32, %c0_i32_0, %c0_i32_1 : i32, i32, i32, i32
  }
  func.func @transform_4(%arg0: i32, %arg1: i32) -> (i32, i32, i32, i32) {
    %c0_i32 = arith.constant 0 : i32
    %c0_i32_0 = arith.constant 0 : i32
    %c0_i32_1 = arith.constant 0 : i32
    %c0_i32_2 = arith.constant 0 : i32
    return %arg1, %c0_i32, %c0_i32_0, %c0_i32_1 : i32, i32, i32, i32
  }
  func.func @transform_5(%arg0: i32, %arg1: i32) -> (i32, i32, i32, i32) {
    %c0_i32 = arith.constant 0 : i32
    %c0_i32_0 = arith.constant 0 : i32
    %c0_i32_1 = arith.constant 0 : i32
    %c0_i32_2 = arith.constant 0 : i32
    return %arg1, %c0_i32, %c0_i32_0, %c0_i32_1 : i32, i32, i32, i32
  }
  func.func @transform_6(%arg0: i32, %arg1: i32) -> (i32, i32, i32) {
    %c0_i32 = arith.constant 0 : i32
    %c0_i32_0 = arith.constant 0 : i32
    %c0_i32_1 = arith.constant 0 : i32
    return %arg1, %c0_i32, %c0_i32_0 : i32, i32, i32
  }
  func.func @transform_7(%arg0: i32, %arg1: i32) -> (i32, i32, i32) {
    %c0_i32 = arith.constant 0 : i32
    %c0_i32_0 = arith.constant 0 : i32
    %c0_i32_1 = arith.constant 0 : i32
    return %arg1, %c0_i32, %c0_i32_0 : i32, i32, i32
  }
  func.func @transform_8(%arg0: i32, %arg1: i32) -> (i32, i32, i32) {
    %c0_i32 = arith.constant 0 : i32
    %c0_i32_0 = arith.constant 0 : i32
    %c0_i32_1 = arith.constant 0 : i32
    return %arg1, %c0_i32, %c0_i32_0 : i32, i32, i32
  }
  func.func @transform_9(%arg0: i32, %arg1: i32) -> (i32, i32, i32) {
    %c0_i32 = arith.constant 0 : i32
    %c0_i32_0 = arith.constant 0 : i32
    %c0_i32_1 = arith.constant 0 : i32
    return %arg0, %c0_i32, %c0_i32_0 : i32, i32, i32
  }
}

</mosaic_0001>

<bundles_post_ra>
// kernel: tpu_custom_call.1
= control target key start
LH: loop header
LB: loop body
LE: loop exit
PB: predicated region body
PF: predicated region fallthrough
CT: control target
= control target key end

     0   :  { %s2387_s0 = inlined_call_operand.vmem [shape: f32[2,8,32], index: 0, kind: input, shape index: {}]   ;;  %s2388_s1 = inlined_call_operand.vmem [shape: f32[2,1,8], index: 1, kind: input, shape index: {}]   ;;  %s2389_s2 = inlined_call_operand.vmem [shape: f32[2,32], index: 2, kind: input, shape index: {}]   ;;  %s2390_s3 = inlined_call_operand.vmem [shape: bf16[2,6,32,16], index: 3, kind: input, shape index: {}]   ;;  %s2391_s4 = inlined_call_operand.vmem [shape: f32[2,6,1,16], index: 4, kind: input, shape index: {}]   ;;  %s2392_s5 = inlined_call_operand.vmem [shape: bf16[2,2,16,32], index: 5, kind: input, shape index: {}]   ;;  %s2393_s6 = inlined_call_operand.vmem [shape: bf16[2,32,64], index: 6, kind: input, shape index: {}]   ;;  %s2394_s7 = inlined_call_operand.vmem [shape: bf16[2,64,32], index: 7, kind: input, shape index: {}]   ;;  %s2395_s8 = inlined_call_operand.vmem [shape: f32[2,8,64], index: 8, kind: input, shape index: {}]   ;;  %s2396_s9 = inlined_call_operand.hbm [shape: f32[2,8,32], index: 9, kind: output, shape index: {}]  }
   0x1   :  { %2410 = sst [smem:[#allocation17_spill]] %s2387_s0 }
   0x2   :  { %2411 = sst [smem:[#allocation18_spill]] %s2390_s3 }
   0x3   :  { %2412 = sst [smem:[#allocation19_spill]] %s2396_s9 }
   0x4   :  { %14 = vsyncpa [#allocation4], 0 }
   0x5   :  { %16 = vsyncpa [#allocation4 + $0x1], 0  ;;  %s2066_s30 = smov 0   ;;  %s2068_s10 = smov 0  }
   0x6   :  { %s2070_s11 = smov 0   ;;  %s2072_s12 = smov 0  }
   0x7   :  { %s2074_s13 = smov 0   ;;  %s2076_s14 = smov 0  }
   0x8   :  { %s2078_s15 = smov 0   ;;  %s2080_s16 = smov 0  }
   0x9 LB: > { %2413 = sst [smem:[#allocation6_spill]] %s1983_s30  ;;  %s1597_s17 = sadd.s32 4294967295, %s2011_s16   ;;  %s2011_s16 = sphi %s2080_s16, %s22_s16   ;;  %s2007_s15 = sphi %s2078_s15, %s2442_s15   ;;  %s2003_s14 = sphi %s2076_s14, %s2441_s14   ;;  %s1999_s13 = sphi %s2074_s13, %s2440_s13   ;;  %s1995_s12 = sphi %s2072_s12, %s2439_s12   ;;  %s1991_s11 = sphi %s2070_s11, %s2438_s11   ;;  %s1987_s10 = sphi %s2068_s10, %s2437_s10   ;;  %s1983_s30 = sphi %s2066_s30, %s2436_s30  }
   0xa   : > { %2414 = sst [smem:[#allocation7_spill]] %s1987_s10  ;;  %s1598_s18 = sadd.s32 4294967294, %s2011_s16  }
   0xb   : > { %2415 = sst [smem:[#allocation8_spill]] %s1991_s11  ;;  %s31_s19 = sadd.s32 1, %s2003_s14 }
   0xc   : > { %2416 = sst [smem:[#allocation9_spill]] %s2003_s14  ;;  %p32_p0 = scmp.ge.s32.totalorder %s31_s19, 2 }
   0xd   : > { %2417 = sst [smem:[#allocation10_spill]] %s2007_s15  ;;  %s34_s20 = sadd.s32 1, %s2007_s15 }
   0xe   : > { %2418 = sst [smem:[#allocation11_spill]] %s2011_s16  ;;  %p280_p1 = scmp.ne.s32.totalorder %s1991_s11, %s1987_s10 }
   0xf   : > { %p281_p2 = scmp.eq.s32.totalorder %s1597_s17, 3  ;;  %s2444_s19 = smov (%p32_p0, %s31_s19), 0 }
  0x10   : > { %2419 = sst [smem:[#allocation12_spill]] %s2444_s19  ;;  %s2446_s20 = smov (!%p32_p0, %s34_s20), %s2007_s15 }
  0x11   : > { %p2115_p3 = por %p281_p2, %p280_p1  ;;  %p286_p4 = scmp.ne.s32.totalorder %s1987_s10, %s1983_s30 }
  0x12   : > { %p36_p5 = scmp.ge.s32.totalorder %s2446_s20, 2  ;;  %p287_p6 = scmp.eq.s32.totalorder %s1598_s18, 3 }
  0x13   : > { %s2420_s21 = scalar_select %p2115_p3, 1, 0 }
  0x14   : > { %p1601_p7 = scmp.ge.s32.totalorder %s2011_s16, 1  ;;  %p367_p8 = scmp.lt.s32.totalorder %s2011_s16, 5 }
  0x15   : > { %2421 = sst [smem:[#allocation13_spill]] %s2420_s21  ;;  %s2448_s20 = smov (%p36_p5, %s2446_s20), 0 }
  0x16   : > { %2422 = sst [smem:[#allocation14_spill]] %s2448_s20  ;;  %p2125_p9 = por %p287_p6, %p286_p4 }
  0x17   : > { %p368_p10 = pnand %p1601_p7, %p367_p8  ;;  %s267_s23 = ssub.s32 %s2007_s15, %s2448_s20 }
  0x18   : > { %s2423_s22 = scalar_select %p2125_p9, 1, 0 }
  0x19   : > { %s270_s24 = sadd.s32 1, %s1991_s11  ;;  %p268_p11 = scmp.eq.s32.totalorder %s267_s23, 0 }
  0x1a   : > { %2424 = sst [smem:[#allocation15_spill]] %s2423_s22  ;;  %371 = sbr.rel (%p368_p10) target bundleno = 2671 (0xa6f), region = 56 }
  0x1b   : > { %s2133_s25 = scalar_select %p268_p11, %s1991_s11, %s270_s24  }
  0x1c   : > { %s2400_s26 = sand.u32 (!%p368_p10), 1, %s1987_s10   ;;  %p433_p12 = scmp.lt.s32.totalorder (!%p368_p10), %s1999_s13, 1 }
  0x1d   : > { %2425 = sst [smem:[#allocation16_spill]] %s2133_s25  ;;  %s2139_s27 = sshll.u32 (!%p368_p10), %s2400_s26, 3 }
  0x1e   : > { %p440_p13 = scmp.lt.s32.totalorder (!%p368_p10), %s1995_s12, 1  ;;  %s2426_s0 = sld [smem:[#allocation17_spill]] (!%p368_p10) }
  0x1f   : > { %s2427_s3 = sld [smem:[#allocation18_spill]] (!%p368_p10)  ;;  %s432_s10 = scalar_lea.vmem (!%p368_p10), [#allocation3], %s2139_s27 }
  0x20   : > { %p1612_p0 = scmp.ne.s32.totalorder (!%p368_p10), %s1995_s12, 0 }
  0x21   : > { %s2143_s28 = scalar_select %p433_p12, %s1999_s13, 1 }
  0x22   : > { %s441_s29 = scalar_select %p440_p13, %s1995_s12, 1 }
  0x23   : > { %s1603_s17 = sshll.u32 %s2143_s28, 3  ;;  %472 = sbr.rel (%p1612_p0) target bundleno = 352 (0x160), region = 60  ;;  %vm476_vm0 = vcmask (!%p1612_p0), 261120   ;;  %v1613_v11 = vld [vmem:[%s2389_s2] ss:$0 sm:$0xff] (!%p1612_p0) }
  0x24   : > { %s436_s15 = scalar_lea.vmem %s2426_s0, %s1603_s17  ;;  %s1806_s14 = smul.u32 96, %s441_s29  ;;  %v1614_v13 = vld [vmem:[%s2389_s2 + $0x1] ss:$0 sm:$0xff] (!%p1612_p0) }
  0x25   : > { %s1807_s25 = smul.u32 6, %s441_s29  ;;  %s1661_s26 = sshll.u32 %s441_s29, 4  ;;  %v473_v0 = vld [vmem:[%s436_s15] sm:$0xff] (!%p1612_p0) }
  0x26   : > { %s2157_s30 = scalar_lea.vmem %s2427_s3, %s1806_s14  ;;  %s2162_s21 = scalar_lea.vmem %s2392_s5, %s1661_s26  ;;  %v477_v1 = vsel (!%p1612_p0), %vm476_vm0, %v473_v0, 0.0 }
  0x27   : > { %s2167_s23 = scalar_lea.vmem %s2391_s4, %s1807_s25  ;;  %s2172_s17 = scalar_lea.vmem %s2393_s6, %s1661_s26  ;;  %478 = vadd.xlane.f32.xlu0 (!%p1612_p0), %v477_v1 }
  0x28   : > { %s1663_s24 = sshll.u32 %s441_s29, 5  ;;  %s1611_s0 = sshll.u32 %s441_s29, 3 }
  0x29   : > { %s2177_s22 = scalar_lea.vmem %s2394_s7, %s1663_s24  ;;  %s2182_s3 = scalar_lea.vmem %s2395_s8, %s1611_s0 }
  0xb4   : > { %v479_v2 = vpop.xlane.xlu0 %478 }
  0xb5   : > { %v481_v3 = vmul.f32 0.03125, %v479_v2 }
  0xb7   : > { %v482_v4 = vsub.f32 %v473_v0, %v481_v3 }
  0xb9   : > { %v483_v5 = vmul.f32 %v482_v4, %v482_v4 }
  0xbb   : > { %v484_v6 = vsel %vm476_vm0, %v483_v5, 0.0 }
  0xbc   : > { %485 = vadd.xlane.f32.xlu0 %v484_v6 }
 0x149   : > { %v486_v7 = vpop.xlane.xlu0 %485 }
 0x14a   : > { %v487_v8 = vmul.f32 0.03125, %v486_v7 }
 0x14c   : > { %v488_v9 = vadd.f32 1e-12, %v487_v8 }
 0x14e   : > { %1881 = vrsqrt.f32 %v488_v9 }
 0x158   : > { %v1882_v10 = vpop.eup %1881 }
 0x159   : > { %v490_v12 = vmul.f32 %v1882_v10, %v482_v4 }
 0x15b   : > { %v495_v14 = vmul.f32 %v1613_v11, %v490_v12 }
 0x15d   : > { %v500_v15 = vadd.f32 %v1614_v13, %v495_v14 }
 0x15f   : > { %501 = vst.msk [vmem:[#allocation2] sm:$0xff] %vm476_vm0, %v500_v15 }
 0x160 PF: > { %v1883_v16 = vld [vmem:[%s2157_s30] sm:$0xff]   ;;  %v2013_v17 = vmov 0.0   ;;  %v1884_v18 = vld [vmem:[%s2157_s30 + $0x10] sm:$0xff]   ;;  %v1885_v19 = vld [vmem:[%s2157_s30 + $0x8] sm:$0xff]   ;;  %vm2014_vm1 = vmmov 0   ;;  %vm583_vm2 = vcmask 261120   ;;  %s2428_s24 = scalar_lea.vmem %s2388_s1, %s2143_s28 }
 0x161   : > { %1702 = vmatprep.subr.bf16.mxu0 %v2013_v17  ;;  %1710 = vmatprep.subr.bf16.mxu1 %v2013_v17  ;;  %v1886_v20 = vld [vmem:[%s2157_s30 + $0x18] sm:$0xff]   ;;  %v1887_v23 = vld [vmem:[%s2157_s30 + $0x20] sm:$0xff]   ;;  %v1888_v24 = vld [vmem:[%s2157_s30 + $0x30] sm:$0xff]   ;;  %vm898_vm3 = vcmask 130048   ;;  %vm1021_vm4 = vcmask 1043456   ;;  %vm991_vm5 = vcmask 64512  }
 0x162   : > { %1703 = vmatpush3.bf16.msra.mxu0 %v1883_v16  ;;  %1706 = vmatprep.mubr.msk.bf16.mxu0 %vm2014_vm1, %v2013_v17  ;;  %v1889_v25 = vld [vmem:[%s2157_s30 + $0x28] sm:$0xff]   ;;  %v1890_v26 = vld [vmem:[%s2157_s30 + $0x38] sm:$0xff]   ;;  %v1891_v27 = vld [vmem:[%s2157_s30 + $0x40] sm:$0xff]   ;;  %vm1358_vm6 = vcmask 523264   ;;  %p1656_p1 = scmp.ne.s32.totalorder %s1995_s12, 1 }
 0x163   : > { %1711 = vmatpush3.bf16.msra.mxu1 %v1884_v18  ;;  %1704 = vmatprep.subr.bf16.mxu0 %v2013_v17  ;;  %v1892_v28 = vld [vmem:[%s2157_s30 + $0x50] sm:$0xff]   ;;  %v1893_v29 = vld [vmem:[%s2157_s30 + $0x48] sm:$0xff]   ;;  %v1894_v30 = vld [vmem:[%s2157_s30 + $0x58] sm:$0xff]  }
 0x164   : > { %1712 = vmatprep.subr.bf16.mxu1 %v2013_v17  ;;  %1714 = vmatprep.mubr.msk.bf16.mxu1 %vm2014_vm1, %v2013_v17  ;;  %v1617_v39 = vld [vmem:[%s2167_s23 + $0x2] ss:$0 sm:$0xff]  ;;  %v1618_v40 = vld [vmem:[%s2167_s23 + $0x3] ss:$0 sm:$0xff]  ;;  %v1615_v51 = vld [vmem:[%s2167_s23] ss:$0 sm:$0xff] }
 0x165   : > { %v1616_v54 = vld [vmem:[%s2167_s23 + $0x1] ss:$0 sm:$0xff]  ;;  %v1619_v61 = vld [vmem:[%s2167_s23 + $0x4] ss:$0 sm:$0xff]  ;;  %v1620_v62 = vld [vmem:[%s2167_s23 + $0x5] ss:$0 sm:$0xff] }
 0x166   : > { %v2207_v21 = vld [vmem:[#allocation2] sm:$0xff]  ;;  %1705 = vmatpush3.bf16.msra.mxu0 %v1885_v19 }
 0x167   : > { %v504_v22 = vpack.c.bf16 %v2207_v21, %v2207_v21  ;;  %1713 = vmatpush3.bf16.msra.mxu1 %v1886_v20  ;;  %1718 = vmatprep.subr.bf16.mxu0 %v2013_v17  ;;  %v1639_v13 = vld [vmem:[%s2428_s24] ss:$0 sm:$0xff] }
 0x168   : > { %1726 = vmatprep.subr.bf16.mxu1 %v2013_v17 }
 0x169   : > { %1707 = vmatmul.mubr.msk.bf16.vlgmr.msra.gmra.mrb[0].mxu0 %vm583_vm2, %v504_v22 }
 0x16a   : > { %1715 = vmatmul.mubr.msk.bf16.vlgmr.msra.gmra.mrb[0].mxu1 %vm583_vm2, %v504_v22  ;;  %1719 = vmatpush3.bf16.msra.mxu0 %v1887_v23 }
 0x16b   : > { %1727 = vmatpush3.bf16.msra.mxu1 %v1888_v24  ;;  %1720 = vmatprep.subr.bf16.mxu0 %v2013_v17 }
 0x16c   : > { %1728 = vmatprep.subr.bf16.mxu1 %v2013_v17  ;;  %1722 = vmatprep.mubr.msk.bf16.mxu0 %vm2014_vm1, %v2013_v17 }
 0x16d   : > { %1730 = vmatprep.mubr.msk.bf16.mxu1 %vm2014_vm1, %v2013_v17 }
 0x16e   : > { %1721 = vmatpush3.bf16.msra.mxu0 %v1889_v25 }
 0x16f   : > { %1729 = vmatpush3.bf16.msra.mxu1 %v1890_v26  ;;  %1734 = vmatprep.subr.bf16.mxu0 %v2013_v17 }
 0x170   : > { %1742 = vmatprep.subr.bf16.mxu1 %v2013_v17 }
 0x171   : > { %1723 = vmatmul.mubr.msk.bf16.vlgmr.msra.gmra.mrb[4].mxu0 %vm583_vm2, %v504_v22 }
 0x172   : > { %1731 = vmatmul.mubr.msk.bf16.vlgmr.msra.gmra.mrb[4].mxu1 %vm583_vm2, %v504_v22  ;;  %1738 = vmatprep.mubr.msk.bf16.mxu0 %vm2014_vm1, %v2013_v17 }
 0x173   : > { %1746 = vmatprep.mubr.msk.bf16.mxu1 %vm2014_vm1, %v2013_v17  ;;  %1735 = vmatpush3.bf16.msra.mxu0 %v1891_v27 }
 0x174   : > { %1743 = vmatpush3.bf16.msra.mxu1 %v1892_v28  ;;  %1736 = vmatprep.subr.bf16.mxu0 %v2013_v17 }
 0x175   : > { %1744 = vmatprep.subr.bf16.mxu1 %v2013_v17 }
 0x177   : > { %1737 = vmatpush3.bf16.msra.mxu0 %v1893_v29 }
 0x178   : > { %1745 = vmatpush3.bf16.msra.mxu1 %v1894_v30  ;;  %1750 = vmatprep.subr.bf16.mxu0 %v2013_v17 }
 0x179   : > { %1756 = vmatprep.subr.bf16.mxu1 %v2013_v17 }
 0x17a   : > { %1739 = vmatmul.mubr.msk.bf16.vlgmr.msra.gmra.mrb[8].mxu0 %vm583_vm2, %v504_v22 }
 0x17b   : > { %1747 = vmatmul.mubr.msk.bf16.vlgmr.msra.gmra.mrb[8].mxu1 %vm583_vm2, %v504_v22  ;;  %1752 = vmatprep.mubr.msk.bf16.mxu0 %vm2014_vm1, %v2013_v17 }
 0x17c   : > { %1758 = vmatprep.mubr.msk.bf16.mxu1 %vm2014_vm1, %v2013_v17 }
 0x23c   : > { %v621_v31 = vpop.f32.mrb[0].mxu0 }
 0x23d   : > { %v1708_v32 = vpop.f32.mrb[1].mxu0  ;;  %v673_v33 = vpop.f32.mrb[0].mxu1  ;;  %v622_v57 = vadd.f32 %v1615_v51, %v621_v31 }
 0x23e   : > { %v624_v34 = vpop.f32.mrb[2].mxu0  ;;  %v1716_v35 = vpop.f32.mrb[1].mxu1  ;;  %v674_v58 = vadd.f32 %v1616_v54, %v673_v33 }
 0x23f   : > { %v1709_v36 = vpop.f32.mrb[3].mxu0  ;;  %v676_v37 = vpop.f32.mrb[2].mxu1  ;;  %v887_v59 = vpack.c.bf16 %v622_v57, %v622_v57 }
 0x240   : > { %v1717_v38 = vpop.f32.mrb[3].mxu1  ;;  %v888_v60 = vpack.c.bf16 %v674_v58, %v674_v58  ;;  %v1218_v58 = vlaneseq }
 0x244   : > { %v725_v41 = vpop.f32.mrb[4].mxu0 }
 0x245   : > { %v726_v42 = vadd.f32 %v1617_v39, %v725_v41  ;;  %v777_v43 = vpop.f32.mrb[4].mxu1  ;;  %v1724_v44 = vpop.f32.mrb[5].mxu0 }
 0x246   : > { %v778_v45 = vadd.f32 %v1618_v40, %v777_v43  ;;  %v728_v46 = vpop.f32.mrb[6].mxu0  ;;  %v1732_v47 = vpop.f32.mrb[5].mxu1 }
 0x247   : > { %v889_v48 = vpack.c.bf16 %v726_v42, %v726_v42  ;;  %v1725_v49 = vpop.f32.mrb[7].mxu0  ;;  %v780_v50 = vpop.f32.mrb[6].mxu1  ;;  %v1895_v46 = vld [vmem:[%s2162_s21] sm:$0xff]   ;;  %v1896_v47 = vld [vmem:[%s2162_s21 + $0x8] sm:$0xff]  }
 0x248   : > { %v890_v52 = vpack.c.bf16 %v778_v45, %v778_v45  ;;  %v1733_v53 = vpop.f32.mrb[7].mxu1 }
 0x249   : > { %v903_v55 = vsel %vm898_vm3, %v889_v48, 0 }
 0x24a   : > { %v949_v56 = vsel %vm898_vm3, %v890_v52, 0  ;;  %1751 = vmatpush3.bf16.xpose.msra.mxu0 %v903_v55 }
 0x24b   : > { %1757 = vmatpush3.bf16.xpose.msra.mxu1 %v949_v56  ;;  %1762 = vmatprep.subr.bf16.mxu0 %v2013_v17 }
 0x24c   : > { %1768 = vmatprep.subr.bf16.mxu1 %v2013_v17 }
 0x24d   : > { %v829_v63 = vpop.f32.mrb[8].mxu0 }
 0x24e   : > { %v881_v0 = vpop.f32.mrb[8].mxu1  ;;  %v830_v1 = vadd.f32 %v1619_v61, %v829_v63  ;;  %v1740_v2 = vpop.f32.mrb[9].mxu0  ;;  %v2294_v63 = vld [vmem:[%s2182_s3] sm:$0xff] }
 0x24f   : > { %v882_v3 = vadd.f32 %v1620_v62, %v881_v0  ;;  %v1748_v4 = vpop.f32.mrb[9].mxu1  ;;  %v832_v5 = vpop.f32.mrb[10].mxu0 }
 0x250   : > { %v884_v6 = vpop.f32.mrb[10].mxu1  ;;  %v1016_v7 = vpack.c.bf16 %v830_v1, %v830_v1  ;;  %v1741_v8 = vpop.f32.mrb[11].mxu0 }
 0x251   : > { %1753 = vmatmul.mubr.msk.bf16.vlgmr.msra.gmra.mrb[12].mxu0 %vm898_vm3, %v887_v59  ;;  %v1017_v9 = vpack.c.bf16 %v882_v3, %v882_v3  ;;  %v1749_v10 = vpop.f32.mrb[11].mxu1  ;;  %v2290_v59 = vshrl.u32 %v1218_v58, 7 }
 0x252   : > { %1759 = vmatmul.mubr.msk.bf16.vlgmr.msra.gmra.mrb[12].mxu1 %vm898_vm3, %v888_v60  ;;  %1764 = vmatprep.mubr.msk.bf16.mxu0 %vm2014_vm1, %v2013_v17  ;;  %v1023_v11 = vsel %vm1021_vm4, %v1016_v7, 0 }
 0x253   : > { %1770 = vmatprep.mubr.msk.bf16.mxu1 %vm2014_vm1, %v2013_v17  ;;  %v1069_v12 = vsel %vm1021_vm4, %v1017_v9, 0  ;;  %1763 = vmatpush3.bf16.msra.mxu0 %v1023_v11  ;;  %v1220_v61 = vsub.s32 0, %v2290_v59 }
 0x254   : > { %1769 = vmatpush3.bf16.msra.mxu1 %v1069_v12  ;;  %1774 = vmatprep.subr.bf16.mxu0 %v2013_v17 }
 0x255   : > { %1780 = vmatprep.subr.bf16.mxu1 %v2013_v17  ;;  %v1221_v3 = vrot.slane %v2294_v63, %v1220_v61 }
 0x324   : > { %v939_v14 = vpop.f32.mrb[12].mxu0 }
 0x325   : > { %v940_v15 = vadd.f32 %v1639_v13, %v939_v14  ;;  %v985_v16 = vpop.f32.mrb[12].mxu1  ;;  %v1754_v18 = vpop.f32.mrb[13].mxu0 }
 0x326   : > { %v1760_v19 = vpop.f32.mrb[13].mxu1  ;;  %v942_v20 = vpop.f32.mrb[14].mxu0  ;;  %v986_v22 = vadd.f32 %v1639_v13, %v985_v16 }
 0x327   : > { %v988_v23 = vpop.f32.mrb[14].mxu1  ;;  %v1755_v24 = vpop.f32.mrb[15].mxu0  ;;  %v992_v25 = vsel %vm991_vm5, %v940_v15, -inf  ;;  %v1897_v19 = vld [vmem:[%s2172_s17] sm:$0xff]   ;;  %v1898_v20 = vld [vmem:[%s2172_s17 + $0x8] sm:$0xff]  }
 0x328   : > { %v1761_v26 = vpop.f32.mrb[15].mxu1  ;;  %993 = vmax.xlane.f32.xlu0 %v992_v25  ;;  %v995_v27 = vsel %vm991_vm5, %v986_v22, -inf  ;;  %v1240_v24 = vsub.s32 3, %v2290_v59  ;;  %v1245_v25 = vsub.s32 4, %v2290_v59 }
 0x32a   : > { %v1241_v26 = vrot.slane %v2294_v63, %v1240_v24 }
 0x32c   : > { %996 = vmax.xlane.f32.xlu0 %v995_v27 }
 0x3b5   : > { %v994_v28 = vpop.xlane.xlu0 %993 }
 0x3b6   : > { %v998_v29 = vsub.f32 %v940_v15, %v994_v28 }
 0x3b8   : > { %v1000_v30 = vmul.f32 1.442695, %v998_v29  ;;  %v1246_v29 = vrot.slane %v2294_v63, %v1245_v25 }
 0x3b9   : > { %v997_v31 = vpop.xlane.xlu0 %996 }
 0x3ba   : > { %1903 = vpow2.f32 %v1000_v30  ;;  %v999_v32 = vsub.f32 %v986_v22, %v997_v31 }
 0x3bc   : > { %v1002_v33 = vmul.f32 1.442695, %v999_v32 }
 0x3be   : > { %1905 = vpow2.f32 %v1002_v33  ;;  %v1899_v33 = vld [vmem:[%s2177_s22] sm:$0xff]  }
 0x3c4   : > { %v1904_v34 = vpop.eup %1903 }
 0x3c5   : > { %v1004_v35 = vsel %vm991_vm5, %v1904_v34, 0.0 }
 0x3c6   : > { %1005 = vadd.xlane.f32.xlu1 %v1004_v35  ;;  %v1901_v35 = vld [vmem:[%s2177_s22 + $0x10] sm:$0xff]  }
 0x3c8   : > { %v1906_v36 = vpop.eup %1905 }
 0x3c9   : > { %v1007_v37 = vsel %vm991_vm5, %v1906_v36, 0.0 }
 0x3ca   : > { %1008 = vadd.xlane.f32.xlu1 %v1007_v37  ;;  %v1255_v37 = vsub.s32 1, %v2290_v59 }
 0x453   : > { %v1006_v38 = vpop.xlane.xlu1 %1005 }
 0x454   : > { %1907 = vrcp.f32 %v1006_v38  ;;  %v1256_v38 = vrot.slane %v2294_v63, %v1255_v37 }
 0x457   : > { %v1009_v39 = vpop.xlane.xlu1 %1008 }
 0x458   : > { %1909 = vrcp.f32 %v1009_v39 }
 0x45e   : > { %v1908_v40 = vpop.eup %1907 }
 0x45f   : > { %v1012_v41 = vmul.f32 %v1908_v40, %v1904_v34  ;;  %v1900_v34 = vld [vmem:[%s2177_s22 + $0x8] sm:$0xff]  }
 0x461   : > { %v1014_v42 = vpack.c.bf16 %v1012_v41, %v1012_v41 }
 0x462   : > { %v1910_v43 = vpop.eup %1909 }
 0x463   : > { %v1013_v44 = vmul.f32 %v1910_v43, %v1906_v36  ;;  %1765 = vmatmul.mubr.msk.bf16.vlgmr.msra.gmra.mrb[16].mxu0 %vm991_vm5, %v1014_v42  ;;  %v1902_v36 = vld [vmem:[%s2177_s22 + $0x18] sm:$0xff]  }
 0x464   : > { %1776 = vmatprep.mubr.msk.bf16.mxu0 %vm2014_vm1, %v2013_v17  ;;  %1775 = vmatpush3.bf16.msra.mxu0 %v1895_v46 }
 0x465   : > { %v1015_v45 = vpack.c.bf16 %v1013_v44, %v1013_v44  ;;  %1786 = vmatprep.subr.bf16.mxu0 %v2013_v17 }
 0x467   : > { %1771 = vmatmul.mubr.msk.bf16.vlgmr.msra.gmra.mrb[16].mxu1 %vm991_vm5, %v1015_v45 }
 0x468   : > { %1782 = vmatprep.mubr.msk.bf16.mxu1 %vm2014_vm1, %v2013_v17  ;;  %1781 = vmatpush3.bf16.msra.mxu1 %v1896_v47 }
 0x469   : > { %1794 = vmatprep.subr.bf16.mxu1 %v2013_v17 }
 0x536   : > { %v1059_v48 = vpop.f32.mrb[16].mxu0 }
 0x537   : > { %v1111_v49 = vpack.c.bf16 %v1059_v48, %v1059_v48  ;;  %v1766_v50 = vpop.f32.mrb[17].mxu0 }
 0x538   : > { %v1062_v51 = vpop.f32.mrb[18].mxu0 }
 0x539   : > { %v1767_v52 = vpop.f32.mrb[19].mxu0  ;;  %1777 = vmatmul.mubr.msk.bf16.vlgmr.msra.gmra.mrb[20].mxu0 %vm898_vm3, %v1111_v49 }
 0x53a   : > { %v1105_v53 = vpop.f32.mrb[16].mxu1  ;;  %1790 = vmatprep.mubr.msk.bf16.mxu0 %vm2014_vm1, %v2013_v17  ;;  %1787 = vmatpush3.bf16.msra.mxu0 %v1897_v19 }
 0x53b   : > { %v1112_v54 = vpack.c.bf16 %v1105_v53, %v1105_v53  ;;  %v1772_v55 = vpop.f32.mrb[17].mxu1  ;;  %1788 = vmatprep.subr.bf16.mxu0 %v2013_v17  ;;  %v1332_v53 = vsub.s32 2, %v2290_v59 }
 0x53c   : > { %v1108_v56 = vpop.f32.mrb[18].mxu1 }
 0x53d   : > { %v1773_v57 = vpop.f32.mrb[19].mxu1  ;;  %1783 = vmatmul.mubr.msk.bf16.vlgmr.msra.gmra.mrb[20].mxu1 %vm898_vm3, %v1112_v54  ;;  %v1333_v54 = vrot.slane %v2294_v63, %v1332_v53 }
 0x53e   : > { %1802 = vmatprep.mubr.msk.bf16.mxu1 %vm2014_vm1, %v2013_v17  ;;  %1789 = vmatpush3.bf16.msra.mxu0 %v1898_v20 }
 0x53f   : > { %1795 = vmatpush3.bf16.msra.mxu1 %v1899_v33 }
 0x540   : > { %1796 = vmatprep.subr.bf16.mxu1 %v2013_v17 }
 0x543   : > { %1797 = vmatpush3.bf16.msra.mxu1 %v1900_v34 }
 0x544   : > { %1798 = vmatprep.subr.bf16.mxu1 %v2013_v17 }
 0x547   : > { %1799 = vmatpush3.bf16.msra.mxu1 %v1901_v35 }
 0x548   : > { %1800 = vmatprep.subr.bf16.mxu1 %v2013_v17 }
 0x54b   : > { %1801 = vmatpush3.bf16.msra.mxu1 %v1902_v36 }
 0x60c   : > { %v1160_v60 = vpop.f32.mrb[20].mxu0 }
 0x60d   : > { %v1778_v62 = vpop.f32.mrb[21].mxu0  ;;  %v1215_v4 = vsel %vm583_vm2, %v1160_v60, 0.0 }
 0x60e   : > { %v1163_v0 = vpop.f32.mrb[22].mxu0 }
 0x60f   : > { %v1779_v1 = vpop.f32.mrb[23].mxu0 }
 0x610   : > { %v1209_v2 = vpop.f32.mrb[20].mxu1 }
 0x611   : > { %v1216_v5 = vsel %vm583_vm2, %v1209_v2, 0.0  ;;  %v1784_v6 = vpop.f32.mrb[21].mxu1 }
 0x612   : > { %v1217_v7 = vadd.f32 %v1216_v5, %v1215_v4  ;;  %v1212_v8 = vpop.f32.mrb[22].mxu1 }
 0x613   : > { %v1785_v9 = vpop.f32.mrb[23].mxu1  ;;  %v1418_v8 = vsub.s32 5, %v2290_v59 }
 0x614   : > { %v1222_v10 = vadd.f32 %v1221_v3, %v1217_v7  ;;  %v1423_v9 = vsub.s32 6, %v2290_v59 }
 0x616   : > { %v1223_v11 = vadd.f32 %v1222_v10, %v2207_v21  ;;  %v1419_v10 = vrot.slane %v2294_v63, %v1418_v8 }
 0x618   : > { %v1224_v12 = vsel %vm583_vm2, %v1223_v11, 0.0 }
 0x619   : > { %1225 = vadd.xlane.f32.xlu0 %v1224_v12  ;;  %v1424_v12 = vrot.slane %v2294_v63, %v1423_v9 }
 0x6a6   : > { %v1226_v13 = vpop.xlane.xlu0 %1225 }
 0x6a7   : > { %v1228_v14 = vmul.f32 0.03125, %v1226_v13 }
 0x6a9   : > { %v1229_v15 = vsub.f32 %v1223_v11, %v1228_v14 }
 0x6ab   : > { %v1230_v16 = vmul.f32 %v1229_v15, %v1229_v15 }
 0x6ad   : > { %v1231_v18 = vsel %vm583_vm2, %v1230_v16, 0.0 }
 0x6ae   : > { %1232 = vadd.xlane.f32.xlu1 %v1231_v18 }
 0x73b   : > { %v1233_v22 = vpop.xlane.xlu1 %1232 }
 0x73c   : > { %v1234_v21 = vmul.f32 0.03125, %v1233_v22 }
 0x73e   : > { %v1235_v23 = vadd.f32 1e-12, %v1234_v21 }
 0x740   : > { %1911 = vrsqrt.f32 %v1235_v23 }
 0x74a   : > { %v1912_v27 = vpop.eup %1911 }
 0x74b   : > { %v1237_v28 = vmul.f32 %v1912_v27, %v1229_v15 }
 0x74d   : > { %v1242_v30 = vmul.f32 %v1241_v26, %v1237_v28 }
 0x74f   : > { %v1247_v31 = vadd.f32 %v1246_v29, %v1242_v30 }
 0x751   : > { %v1248_v32 = vpack.c.bf16 %v1247_v31, %v1247_v31 }
 0x753   : > { %1791 = vmatmul.mubr.msk.bf16.vlgmr.msra.gmra.mrb[24].mxu0 %vm583_vm2, %v1248_v32 }
 0x826   : > { %v1306_v39 = vpop.f32.mrb[24].mxu0 }
 0x827   : > { %v1307_v40 = vadd.f32 %v1306_v39, %v1256_v38  ;;  %v1792_v41 = vpop.f32.mrb[25].mxu0 }
 0x828   : > { %v1309_v42 = vpop.f32.mrb[26].mxu0 }
 0x829   : > { %v1313_v43 = vmul.f32 0.044715, %v1307_v40  ;;  %v1793_v44 = vpop.f32.mrb[27].mxu0  ;;  %v1312_v50 = vmul.f32 0.5, %v1307_v40 }
 0x82b   : > { %v1314_v45 = vmul.f32 %v1313_v43, %v1307_v40 }
 0x82d   : > { %v1315_v46 = vmul.f32 %v1314_v45, %v1307_v40 }
 0x82f   : > { %v1316_v47 = vadd.f32 %v1315_v46, %v1307_v40 }
 0x831   : > { %v1317_v48 = vmul.f32 0.7978846, %v1316_v47 }
 0x833   : > { %1913 = vtanh.f32 %v1317_v48 }
 0x83d   : > { %v1914_v49 = vpop.eup %1913 }
 0x83e   : > { %v1319_v51 = vadd.f32 1.0, %v1914_v49 }
 0x840   : > { %v1320_v17 = vmul.f32 %v1319_v51, %v1312_v50 }
 0x842   : > { %v1321_v52 = vpack.c.bf16 %v1320_v17, %v1320_v17 }
 0x844   : > { %1803 = vmatmul.mubr.msk.bf16.vlgmr.msra.gmra.mrb[24].mxu1 %vm1358_vm6, %v1321_v52 }
 0x917   : > { %v1396_v55 = vpop.f32.mrb[24].mxu1 }
 0x918   : > { %v1397_v56 = vadd.f32 %v1396_v55, %v1333_v54  ;;  %v1804_v57 = vpop.f32.mrb[25].mxu1 }
 0x919   : > { %v1399_v58 = vpop.f32.mrb[26].mxu1 }
 0x91a   : > { %v1805_v60 = vpop.f32.mrb[27].mxu1  ;;  %v1402_v61 = vadd.f32 %v1397_v56, %v1247_v31 }
 0x91c   : > { %v1403_v62 = vsel %vm583_vm2, %v1402_v61, 0.0 }
 0x91d   : > { %1404 = vadd.xlane.f32.xlu0 %v1403_v62 }
 0x9aa   : > { %v1405_v0 = vpop.xlane.xlu0 %1404 }
 0x9ab   : > { %v1406_v1 = vmul.f32 0.03125, %v1405_v0 }
 0x9ad   : > { %v1407_v2 = vsub.f32 %v1402_v61, %v1406_v1 }
 0x9af   : > { %v1408_v3 = vmul.f32 %v1407_v2, %v1407_v2 }
 0x9b1   : > { %v1409_v4 = vsel %vm583_vm2, %v1408_v3, 0.0 }
 0x9b2   : > { %1410 = vadd.xlane.f32.xlu1 %v1409_v4 }
 0xa3f   : > { %v1411_v5 = vpop.xlane.xlu1 %1410 }
 0xa40   : > { %v1412_v6 = vmul.f32 0.03125, %v1411_v5 }
 0xa42   : > { %v1413_v7 = vadd.f32 1e-12, %v1412_v6 }
 0xa44   : > { %1915 = vrsqrt.f32 %v1413_v7 }
 0xa4e   : > { %v1916_v11 = vpop.eup %1915 }
 0xa4f   : > { %v1415_v13 = vmul.f32 %v1916_v11, %v1407_v2  ;;  %1430 = sbr.rel (%p1656_p1) target bundleno = 2646 (0xa56), region = 64 }
 0xa51   : > { %v1420_v14 = vmul.f32 %v1419_v10, %v1415_v13 }
 0xa53   : > { %v1425_v15 = vadd.f32 %v1424_v12, %v1420_v14 }
 0xa55   : > { %1426 = vst.msk [vmem:[#allocation2] sm:$0xff] %vm583_vm2, %v1425_v15  ;;  %1431 = vst.msk [vmem:[%s432_s10] sm:$0xff] (!%p1656_p1), %vm583_vm2, %v1425_v15 }
 0xa56 PF: > { %s2429_s3 = sld [smem:[#allocation7_spill]]  ;;  %s1658_s28 = sshll.u32 %s1999_s13, 7 }
 0xa57   : > { %s2431_s19 = sld [smem:[#allocation19_spill]]  ;;  %s1446_s17 = sshll.u32 %s432_s10, 4  ;;  %s1447_s17 = int_to_ptr.vmem [resolvable:$true] %s1446_s17 }
 0xa58   : > { %s1917_s14 = scalar_lea.vmem %s1447_s17, 128  ;;  %s2015_s22 = smov [#allocation3]  }
 0xa59   : > { %p1918_p2 = scmp.ne.s32.totalorder %s1447_s17, %s1917_s14  ;;  %s1921_s9 = sshll.u32 %s2015_s22, 4  ;;  %s1922_s9 = int_to_ptr.vmem [resolvable:$false] %s1921_s9 }
 0xa5a   : > { %s1923_s16 = scalar_lea.vmem %s1922_s9, 256  ;;  %p1924_p6 = scmp.lt.s32.totalorder %s1447_s17, %s1922_s9 }
 0xa5b   : > { %p1919_p4 = pnand %p1918_p2, %p2115_p3  ;;  %p1925_p7 = scmp.lt.s32.totalorder %s1923_s16, %s1917_s14 }
 0xa5c   : > { %s2432_s12 = sand.u32 1, %s2429_s3  }
 0xa5d   : > { %s2336_s20 = scalar_lea.hbm %s2431_s19, %s1658_s28  ;;  %s1433_s11 = scalar_lea.sflag [#allocation4], %s2432_s12 }
 0xa5e   : > { %p1920_p5 = pneg %p1919_p4  ;;  %p1926_p8 = por %p1925_p7, %p1924_p6 }
 0xa60   : > { %p1927_p10 = pnand %p1926_p8, %p1920_p5 }
 0xa62   : > { %1930 = shalt.err (!%p1927_p10)
}
 0xa63   : > { %s1931_s13 = scalar_lea.hbm %s2336_s20, 128  ;;  %s1935_s0 = scalar_lea.hbm %s2431_s19, 256 }
 0xa64   : > { %p1932_p11 = scmp.ne.s32.totalorder %s2336_s20, %s1931_s13  ;;  %p1936_p0 = scmp.lt.u32.totalorder %s2336_s20, %s2431_s19 }
 0xa65   : > { %p1937_p1 = scmp.lt.u32.totalorder %s1935_s0, %s1931_s13  ;;  %p1939_p4 = scmp.lt.u32.totalorder %s1931_s13, %s2336_s20 }
 0xa66   : > { %p1933_p12 = pnand %p1932_p11, %p2115_p3 }
 0xa67   : > { %p1938_p2 = por %p1937_p1, %p1936_p0 }
 0xa68   : > { %p1934_p13 = pneg %p1933_p12 }
 0xa69   : > { %p1940_p5 = por %p1939_p4, %p1938_p2 }
 0xa6b   : > { %p1941_p6 = pnand %p1940_p5, %p1934_p13 }
 0xa6d   : > { %1944 = shalt.err (!%p1941_p6)
}
 0xa6e   : > { %1808 = dma.vmem_to_hbm [thread:$0]  (%p2115_p3), %s1447_s17, 128, %s2336_s20, %s1433_s11  }
 0xa6f PF: > { %s2433_s26 = sld [smem:[#allocation11_spill]]  ;;  %s2434_s30 = sld [smem:[#allocation6_spill]] }
 0xa75   : > { %p1814_p7 = scmp.ge.s32.totalorder %s2433_s26, 2  ;;  %s1458_s24 = sand.u32 1, %s2434_s30  }
 0xa76   : > { %s1459_s3 = scalar_lea.sflag [#allocation4], %s1458_s24 }
 0xa77   : > { %p1811_p8 = pnand %p1814_p7, %p2125_p9 }
 0xa79   : > { %1978 = dma.done.wait (!%p1811_p8), %s1459_s3, 128  }
 0xa7a   : > { %1980 = vsyncadd (!%p1811_p8), %s1459_s3, 4294967168  ;;  %s22_s16 = sadd.s32 1, %s2433_s26   ;;  %s2436_s30 = sld [smem:[#allocation7_spill]] }
 0xa7b   : > { %p19_p10 = scmp.ge.s32.totalorder %s22_s16, 6   ;;  %s2437_s10 = sld [smem:[#allocation8_spill]] }
 0xa7c   : > { %s2438_s11 = sld [smem:[#allocation16_spill]]  ;;  %s2439_s12 = sld [smem:[#allocation9_spill]] }
 0xa7d   : > { %s2440_s13 = sld [smem:[#allocation10_spill]]  ;;  %s2441_s14 = sld [smem:[#allocation12_spill]] }
 0xa7e   : > { %s2442_s15 = sld [smem:[#allocation14_spill]]  ;;  %21 = sbr.rel (!%p19_p10) target bundleno = 9 (0x9), region = 120 }
 0xa85   :  { %1464 = vsyncpa [#allocation4], 1 }
 0xa86   :  { %1466 = vsyncpa [#allocation4 + $0x1], 1 }

</bundles_post_ra>
